<compile_context>
chip_gen: v6e
topology: v6e:2x2x1
jax: 0.10.0
libtpu: 0.0.40
codegen_flags: <defaults>
</compile_context>

<pallas_src>
import functools
import math

import jax
import jax.numpy as jnp
from jax import lax
from jax.experimental import pallas as pl
from jax.experimental.pallas import tpu as pltpu


def _label_smoothing_kernel(x_ref, tgt_ref, out_ref, *,
                            num_classes, padding_idx, total_rows, tile_n,
                            confidence, smooth_val, c_tgt, c_other, mask_rows):
    tn, Vp = x_ref.shape            # (tile_n, lane-padded class count)
    n_groups = Vp // 128

    tgt = tgt_ref[...]                                   # (tn, 1) int32
    # Rows whose target is padding_idx contribute nothing (true_dist row = 0).
    row_ok = tgt != padding_idx
    if mask_rows:                                        # ragged last block only
        rows = (pl.program_id(0) * tile_n
                + lax.broadcasted_iota(jnp.int32, (tn, 1), 0))
        row_ok = row_ok & (rows < total_rows)

    lane = lax.broadcasted_iota(jnp.int32, (tn, 128), 1)  # 0..127 per lane

    acc = jnp.zeros((tn, 128), jnp.float32)
    for g in range(n_groups):
        lo = g * 128
        hi = lo + 128
        col = lane + lo
        xg = x_ref[:, lo:hi].astype(jnp.float32)          # (tn, 128) log-probs

        is_tgt = col == tgt
        # td value and td*log(td) value: selects between two constants,
        # no jnp.log in the kernel.
        w = jnp.where(is_tgt, jnp.float32(confidence), jnp.float32(smooth_val))
        c = jnp.where(is_tgt, jnp.float32(c_tgt), jnp.float32(c_other))

        valid = row_ok
        # Padding column is zeroed in true_dist; only the one 128-lane group
        # containing it needs the compare (static Python check).
        if lo <= padding_idx < hi:
            valid = valid & (col != padding_idx)
        # Lane-padded / out-of-bounds vocab columns: only the last group.
        if hi > num_classes:
            valid = valid & (col < num_classes)

        acc = acc + jnp.where(valid, c - w * xg, 0.0)

    # Free sublane-split reshape + VPU adds -> lane-dense (8, 128) partial
    # written to this grid step's own output slot (no serialized accumulator).
    out_ref[...] = acc.reshape(tn // 8, 8, 128).sum(axis=0)


def label_smoothing_loss(x, target, *, size, padding_idx, smoothing,
                         tile_n=None):
    """Pallas implementation of LabelSmoothing.forward (returns scalar loss)."""
    N, V = x.shape
    assert V == size
    confidence = 1.0 - smoothing
    # TODO(synk): size == 2 divides by zero here, inherited from the PyTorch module.
    smooth_val = smoothing / (size - 2)
    c_tgt = confidence * math.log(confidence) if confidence > 0.0 else 0.0
    c_other = smooth_val * math.log(smooth_val) if smooth_val > 0.0 else 0.0

    # Lane-dense block width (multiple of 128).  No HBM padding copy: the
    # BlockSpec over-runs the class axis and the kernel masks the tail.
    Vp = ((V + 127) // 128) * 128

    # Auto-size the row tile: ~4 MiB of f32-equivalent rows per block
    # (double-buffered inputs stay well under every chip's VMEM budget),
    # capped at 1024 rows and at the (row-padded) problem size.
    if tile_n is None:
        budget = 4 * 1024 * 1024
        tile_n = max(8, min(1024, (budget // (Vp * 4)) // 8 * 8))
    tile_n = min(tile_n, ((N + 7) // 8) * 8)
    assert tile_n % 8 == 0

    num_blocks = pl.cdiv(N, tile_n)
    mask_rows = (N % tile_n) != 0           # ragged last block -> mask rows in-kernel

    tgt2d = target.astype(jnp.int32).reshape(N, 1)

    kernel = functools.partial(
        _label_smoothing_kernel,
        num_classes=V, padding_idx=padding_idx, total_rows=N, tile_n=tile_n,
        confidence=confidence, smooth_val=smooth_val,
        c_tgt=c_tgt, c_other=c_other, mask_rows=mask_rows)

    partials = pl.pallas_call(
        kernel,
        out_shape=jax.ShapeDtypeStruct((num_blocks * 8, 128), jnp.float32),
        grid=(num_blocks,),
        in_specs=[
            pl.BlockSpec((tile_n, Vp), lambda i: (i, 0)),   # x tile (log-probs)
            pl.BlockSpec((tile_n, 1), lambda i: (i, 0)),    # target tile
        ],
        # Each step owns its own (8, 128) partial-sum block -> no serialized
        # accumulator; the grid axis can be sharded across TensorCores.
        out_specs=pl.BlockSpec((8, 128), lambda i: (i, 0)),
        compiler_params=pltpu.CompilerParams(
            dimension_semantics=("parallel",),
            vmem_limit_bytes=48 * 1024 * 1024),
    )(x, tgt2d)

    return jnp.sum(partials, dtype=jnp.float32)


def _reference_loss(x, target, *, size, padding_idx, smoothing):
    """Pure-JAX reference mirroring the PyTorch module."""
    N, V = x.shape
    confidence = 1.0 - smoothing
    td = jnp.full((N, V), smoothing / (size - 2), jnp.float32)
    td = td.at[jnp.arange(N), target].set(confidence)
    td = td.at[:, padding_idx].set(0.0)
    td = jnp.where((target == padding_idx)[:, None], 0.0, td)
    safe = jnp.where(td > 0, td, 1.0)
    return jnp.sum(jnp.where(td > 0, td * (jnp.log(safe) - x), 0.0))


if __name__ == "__main__":
    SIZE = 16          # vocabulary / class count (x.size(1))
    PADDING_IDX = 0
    SMOOTHING = 0.1
    N = 16             # number of samples

    key = jax.random.PRNGKey(0)
    kx, kt = jax.random.split(key)
    logits = jax.random.normal(kx, (N, SIZE), dtype=jnp.float32)
    x = jax.nn.log_softmax(logits, axis=1)                    # log-probabilities
    target = jax.random.randint(kt, (N,), 0, SIZE, dtype=jnp.int32)
    # Force a couple of padding targets to exercise the row-masking path.
    target = target.at[3].set(PADDING_IDX).at[10].set(PADDING_IDX)

    loss = label_smoothing_loss(x, target, size=SIZE,
                                padding_idx=PADDING_IDX, smoothing=SMOOTHING)
    loss = jax.block_until_ready(loss)

    ref = _reference_loss(x, target, size=SIZE,
                          padding_idx=PADDING_IDX, smoothing=SMOOTHING)
    assert jnp.allclose(loss, ref, rtol=1e-5, atol=1e-5), (loss, ref)

    print("KERNEL_OK")
</pallas_src>

<mosaic_0001>
module attributes {stable_mosaic.version = 11 : i64} {
  func.func @_label_smoothing_kernel(%arg0: i32, %arg1: memref<16x128xf32, #tpu.memory_space<vmem>>, %arg2: memref<16x1xi32, #tpu.memory_space<vmem>>, %arg3: memref<8x128xf32, #tpu.memory_space<vmem>>) attributes {dimension_semantics = [#tpu.dimension_semantics<parallel>], iteration_bounds = array<i64: 1>, scalar_prefetch = 0 : i64, scratch_operands = 0 : i64, tpu.core_type = #tpu.core_type<tc>, window_params = [{transform_indices = @transform_0, window_bounds = array<i64: 16, 128>}, {transform_indices = @transform_1, window_bounds = array<i64: 16, 1>}, {transform_indices = @transform_2, window_bounds = array<i64: 8, 128>}]} {
    %c0 = arith.constant 0 : index
    %c0_0 = arith.constant 0 : index
    %0 = vector.load %arg2[%c0, %c0_0] : memref<16x1xi32, #tpu.memory_space<vmem>>, vector<16x1xi32>
    %c0_i32 = arith.constant 0 : i32
    %1 = vector.broadcast %c0_i32 : i32 to vector<16x1xi32>
    %2 = arith.cmpi ne, %0, %1 : vector<16x1xi32>
    %3 = tpu.iota {dimensions = array<i32: 1>} : vector<16x128xi32>
    %cst = arith.constant 0.000000e+00 : f32
    %4 = vector.broadcast %cst : f32 to vector<16x128xf32>
    %c0_i32_1 = arith.constant 0 : i32
    %5 = vector.broadcast %c0_i32_1 : i32 to vector<16x128xi32>
    %6 = arith.addi %3, %5 : vector<16x128xi32>
    %c0_2 = arith.constant 0 : index
    %c0_3 = arith.constant 0 : index
    %7 = vector.load %arg1[%c0_2, %c0_3] : memref<16x128xf32, #tpu.memory_space<vmem>>, vector<16x128xf32>
    %8 = vector.broadcast %0 : vector<16x1xi32> to vector<16x128xi32>
    %9 = arith.cmpi eq, %6, %8 : vector<16x128xi32>
    %cst_4 = arith.constant 0.899999976 : f32
    %cst_5 = arith.constant 0.00714285718 : f32
    %10 = vector.broadcast %cst_4 : f32 to vector<16x128xf32>
    %11 = vector.broadcast %cst_5 : f32 to vector<16x128xf32>
    %12 = arith.select %9, %10, %11 : vector<16x128xi1>, vector<16x128xf32>
    %cst_6 = arith.constant -0.0948244631 : f32
    %cst_7 = arith.constant -0.035297446 : f32
    %13 = vector.broadcast %cst_6 : f32 to vector<16x128xf32>
    %14 = vector.broadcast %cst_7 : f32 to vector<16x128xf32>
    %15 = arith.select %9, %13, %14 : vector<16x128xi1>, vector<16x128xf32>
    %c0_i32_8 = arith.constant 0 : i32
    %16 = vector.broadcast %c0_i32_8 : i32 to vector<16x128xi32>
    %17 = arith.cmpi ne, %6, %16 : vector<16x128xi32>
    %18 = vector.broadcast %2 : vector<16x1xi1> to vector<16x128xi1>
    %19 = arith.andi %18, %17 : vector<16x128xi1>
    %c16_i32 = arith.constant 16 : i32
    %20 = vector.broadcast %c16_i32 : i32 to vector<16x128xi32>
    %21 = arith.cmpi slt, %6, %20 : vector<16x128xi32>
    %22 = arith.andi %19, %21 : vector<16x128xi1>
    %23 = arith.mulf %12, %7 : vector<16x128xf32>
    %24 = arith.subf %15, %23 : vector<16x128xf32>
    %cst_9 = arith.constant 0.000000e+00 : f32
    %25 = vector.broadcast %cst_9 : f32 to vector<16x128xf32>
    %26 = arith.select %22, %24, %25 : vector<16x128xi1>, vector<16x128xf32>
    %27 = arith.addf %4, %26 : vector<16x128xf32>
    %28 = vector.shape_cast %27 : vector<16x128xf32> to vector<2x8x128xf32>
    %cst_10 = arith.constant dense<0.000000e+00> : vector<8x128xf32>
    %29 = vector.multi_reduction <add>, %28, %cst_10 [0] : vector<2x8x128xf32> to vector<8x128xf32>
    %c0_11 = arith.constant 0 : index
    %c0_12 = arith.constant 0 : index
    %30 = vector.load %arg3[%c0_11, %c0_12] : memref<8x128xf32, #tpu.memory_space<vmem>>, vector<8x128xf32>
    tpu.vector_store %arg3[%c0_11, %c0_12], %29 {strides = array<i32>} : memref<8x128xf32, #tpu.memory_space<vmem>>, vector<8x128xf32>,
    return
  }
  func.func @transform_0(%arg0: i32) -> (i32, i32) {
    %c0_i32 = arith.constant 0 : i32
    %c0_i32_0 = arith.constant 0 : i32
    return %arg0, %c0_i32 : i32, i32
  }
  func.func @transform_1(%arg0: i32) -> (i32, i32) {
    %c0_i32 = arith.constant 0 : i32
    %c0_i32_0 = arith.constant 0 : i32
    return %arg0, %c0_i32 : i32, i32
  }
  func.func @transform_2(%arg0: i32) -> (i32, i32) {
    %c0_i32 = arith.constant 0 : i32
    %c0_i32_0 = arith.constant 0 : i32
    return %arg0, %c0_i32 : i32, i32
  }
}

</mosaic_0001>

<bundles_post_ra>
// kernel: tpu_custom_call.1
= control target key start
LH: loop header
LB: loop body
LE: loop exit
PB: predicated region body
PF: predicated region fallthrough
CT: control target
= control target key end

     0   :  { %v100_v2 = vmov 0   ;;  %s138_s0 = inlined_call_operand.vmem [shape: f32[16,16], index: 0, kind: input, shape index: {}]   ;;  %s139_s1 = inlined_call_operand.vmem [shape: s32[16,1], index: 1, kind: input, shape index: {}]   ;;  %s140_s2 = inlined_call_operand.hbm [shape: f32[8,128], index: 2, kind: output, shape index: {}]  }
   0x1   :  { %v12_v0 = vld [vmem:[%s139_s1] sm:$0xff]  ;;  %v13_v1 = vld [vmem:[%s139_s1 + $0x8] sm:$0xff]  ;;  %76 = vset.pattern.permute.xlu0 %v100_v2  ;;  %77 = vset.pattern.permute.xlu1 %v100_v2 }
   0x2   :  { %vm14_vm0 = vcmp.ne.s32.totalorder %v12_v0, 0  ;;  %vm15_vm1 = vcmp.ne.s32.totalorder %v13_v1, 0 }
   0x3   :  { %7 = vsyncpa [#allocation3], 0  ;;  %21 = vperm.xlu0 %76, %v12_v0   ;;  %v33_v3 = vsel %vm14_vm0, 1, %v100_v2  ;;  %v34_v4 = vsel %vm15_vm1, 1, %v100_v2  ;;  %v16_v5 = vlaneseq  ;;  %v18_v7 = vld [vmem:[%s138_s0] sm:$0xff]  ;;  %v19_v13 = vld [vmem:[%s138_s0 + $0x8] sm:$0xff] }
   0x4   :  { %36 = vperm.xlu1 %77, %v33_v3   ;;  %v101_v10 = vmov 0.007142857   ;;  %v102_v16 = vmov -0.035297446   ;;  %s103_s16 = smov [#allocation2]  }
   0x5   :  { %v17_v6 = vand.u32 127, %v16_v5  ;;  %s64_s0 = sshll.u32 %s103_s16, 4  ;;  %s65_s0 = int_to_ptr.vmem [resolvable:$true] %s64_s0 }
   0x6   :  { %s78_s17 = scalar_lea.vmem %s65_s0, 128  ;;  %p83_p1 = scmp.lt.s32.totalorder %s65_s0, %s65_s0 }
   0x7   :  { %24 = vperm.xlu0 %76, %v13_v1   ;;  %vm32_vm3 = vcmp.ne.s32.totalorder %v17_v6, 0  ;;  %vm45_vm5 = vcmp.lt.s32.totalorder %v17_v6, 16  ;;  %p79_p0 = scmp.ne.s32.totalorder %s65_s0, %s78_s17  ;;  %p84_p2 = scmp.lt.s32.totalorder %s78_s17, %s78_s17 }
   0x8   :  { %39 = vperm.xlu1 %77, %v34_v4  }
   0x9   :  { %p85_p3 = por %p84_p2, %p83_p1 }
   0xb   :  { %p86_p4 = pnand %p85_p3, %p79_p0 }
  0x7e   :  { %v22_v8 = vpop.permute.xlu0 %21 }
  0x7f   :  { %vm26_vm2 = vcmp.eq.s32.totalorder %v17_v6, %v22_v8  ;;  %v37_v9 = vpop.permute.xlu1 %36 }
  0x80   :  { %v28_v11 = vsel %vm26_vm2, 0.9, %v101_v10  ;;  %vm41_vm4 = vcmp.eq.s32.totalorder %v37_v9, 1  ;;  %v30_v17 = vsel %vm26_vm2, -0.09482446, %v102_v16 }
  0x81   :  { %v48_v12 = vmul.f32 %v28_v11, %v18_v7  ;;  %vm43_vm6 = vmand %vm41_vm4, %vm32_vm3 }
  0x82   :  { %v25_v14 = vpop.permute.xlu0 %24  ;;  %vm46_vm10 = vmand %vm43_vm6, %vm45_vm5 }
  0x83   :  { %vm27_vm7 = vcmp.eq.s32.totalorder %v17_v6, %v25_v14  ;;  %v40_v15 = vpop.permute.xlu1 %39  ;;  %v50_v19 = vsub.f32 %v30_v17, %v48_v12 }
  0x84   :  { %v29_v18 = vsel %vm27_vm7, 0.9, %v101_v10  ;;  %vm42_vm8 = vcmp.eq.s32.totalorder %v40_v15, 1  ;;  %v31_v21 = vsel %vm27_vm7, -0.09482446, %v102_v16 }
  0x85   :  { %v49_v20 = vmul.f32 %v29_v18, %v19_v13  ;;  %vm44_vm9 = vmand %vm42_vm8, %vm32_vm3  ;;  %v52_v24 = vsel %vm46_vm10, %v50_v19, 0.0 }
  0x86   :  { %vm47_vm11 = vmand %vm44_vm9, %vm45_vm5 }
  0x87   :  { %v51_v22 = vsub.f32 %v31_v21, %v49_v20 }
  0x89   :  { %v53_v23 = vsel %vm47_vm11, %v51_v22, 0.0 }
  0x8a   :  { %v56_v25 = vadd.f32 %v53_v23, %v52_v24 }
  0x8c   :  { %57 = vst [vmem:[#allocation2] sm:$0xff] %v56_v25 }
  0x8d   :  { %89 = shalt.err (!%p86_p4)
}
  0x8e   :  { %67 = dma.vmem_to_hbm [thread:$0]  %s65_s0, 128, %s140_s2, [#allocation3]  }
  0x8f   :  { %98 = dma.done.wait [#allocation3], 128  }
  0x90   :  { %99 = vsyncadd [#allocation3], 4294967168 }
  0x91   :  { %71 = vsyncpa [#allocation3], 1 }

</bundles_post_ra>
